<compile_context>
chip_gen: v7x
topology: tpu7x:2x2x1
jax: 0.10.0
libtpu: 0.0.40
codegen_flags: <defaults>
</compile_context>

<pallas_src>
import functools

import jax
import jax.numpy as jnp
from jax.experimental import pallas as pl
from jax.experimental.pallas import tpu as pltpu


def _patch_embed_kernel(patch_ref, w_ref, pos_ref, o_ref):
    # patch_ref: (TB, R, K)  MXU dtype; row 0 of every sequence is all-zero (-> cls row).
    # w_ref:     (K, E)      MXU dtype, grid-invariant (resident in VMEM).
    # pos_ref:   (R, E)      f32, grid-invariant; row 0 = cls + pos[0], rows 1: = pos[1:] + bias.
    # o_ref:     (TB, R, E)  output dtype.
    w = w_ref[...]
    pos = pos_ref[...]
    # Small static unroll over the per-step batch tile; each iteration is one clean
    # (R, K) @ (K, E) MXU pass with f32 accumulation followed by a lane-dense store.
    for t in range(patch_ref.shape[0]):
        acc = jnp.dot(patch_ref[t, :, :], w, preferred_element_type=jnp.float32)
        o_ref[t, :, :] = (acc + pos).astype(o_ref.dtype)


def _pick_batch_tile(batch, rows, k, e, in_bytes, out_bytes,
                     max_tb=8, budget_bytes=4 * 1024 * 1024):
    """Largest divisor of `batch` (<= max_tb) whose per-step in+out blocks fit the budget."""
    per_elem = rows * (k * in_bytes + e * out_bytes)
    tb = 1
    for cand in range(1, min(batch, max_tb) + 1):
        if batch % cand == 0 and cand * per_elem <= budget_bytes:
            tb = cand
    return tb


@functools.partial(jax.jit, static_argnames=("patch_size", "mxu_dtype", "out_dtype"))
def patch_embedding(x, conv_w, conv_b, cls_token, positions, *, patch_size,
                    mxu_dtype=jnp.bfloat16, out_dtype=None):
    """x: (B, C, H, W) NCHW.  conv_w: (E, C, P, P).  conv_b: (E,).
    cls_token: (1, 1, E).  positions: (N+1, E).  Returns (B, N+1, E)."""
    B, C, H, W = x.shape
    E = conv_w.shape[0]
    P = patch_size
    if H % P != 0 or W % P != 0:
        raise ValueError("image size must be divisible by patch_size")
    Hp, Wp = H // P, W // P
    N = Hp * Wp
    K = C * P * P
    R = N + 1                                   # cls row + N patch rows
    out_dtype = x.dtype if out_dtype is None else out_dtype

    # TODO(synk): fuse this patchify into the kernel (read raw NCHW + in-kernel im2col) to avoid
    # materializing (B, R, K) in HBM; kept in XLA because the required lane<->sublane relayouts
    # (5-D transpose / W -> (Wp, P) lane split) are not reliably lowered by Mosaic today.
    patches = x.reshape(B, C, Hp, P, Wp, P).transpose(0, 2, 4, 1, 3, 5).reshape(B, N, K)
    # Prepend one all-zero row per sequence: the kernel then produces the cls row as
    # 0 @ W + pos_full[0], making the whole (N+1)-row output one uniform matmul + add.
    patches = jnp.pad(patches, ((0, 0), (1, 0), (0, 0))).astype(mxu_dtype)      # (B, R, K)

    # Conv weight -> matmul weight (K, E) in the MXU dtype (fp8 e4m3 is an option on v7x).
    w_mat = conv_w.reshape(E, K).T.astype(mxu_dtype)

    # Fold the cls token (row 0) and the conv bias (rows 1:) into the positional table, in f32.
    pos_full = positions.astype(jnp.float32)
    pos_full = pos_full.at[0].add(cls_token.reshape(E).astype(jnp.float32))
    pos_full = pos_full.at[1:].add(conv_b.astype(jnp.float32)[None, :])          # (R, E)

    in_bytes = jnp.dtype(mxu_dtype).itemsize
    out_bytes = jnp.dtype(out_dtype).itemsize
    TB = _pick_batch_tile(B, R, K, E, in_bytes, out_bytes)
    grid = (B // TB,)

    # NOTE: the grid-invariant weight/pos blocks are still double-buffered by default;
    # pl.Buffered(1) would halve that VMEM (only matters for ViT-H/g on v7x).
    return pl.pallas_call(
        _patch_embed_kernel,
        out_shape=jax.ShapeDtypeStruct((B, R, E), out_dtype),
        grid_spec=pltpu.PrefetchScalarGridSpec(
            num_scalar_prefetch=0,
            grid=grid,
            in_specs=[
                pl.BlockSpec((TB, R, K), lambda g: (g, 0, 0)),   # per-step patch slab
                pl.BlockSpec((K, E), lambda g: (0, 0)),          # resident weight
                pl.BlockSpec((R, E), lambda g: (0, 0)),          # resident pos (+cls,+bias)
            ],
            out_specs=pl.BlockSpec((TB, R, E), lambda g: (g, 0, 0)),
        ),
        compiler_params=pltpu.CompilerParams(
            dimension_semantics=("parallel",),
            vmem_limit_bytes=48 * 1024 * 1024,
        ),
    )(patches, w_mat, pos_full)


if __name__ == "__main__":
    # Small shapes consistent with the module: in_channels=4, patch_size=4, emb_size=32,
    # img_size=16 -> N = (16/4)^2 = 16 patches, seq = 17.
    B, C, IMG, P, E = 2, 4, 16, 4, 32
    N = (IMG // P) ** 2
    K = C * P * P

    key = jax.random.PRNGKey(0)
    k_x, k_w, k_b, k_cls, k_pos = jax.random.split(key, 5)

    x = jax.random.normal(k_x, (B, C, IMG, IMG), dtype=jnp.float32)
    conv_w = jax.random.normal(k_w, (E, C, P, P), dtype=jnp.float32) * 0.02
    conv_b = jax.random.normal(k_b, (E,), dtype=jnp.float32) * 0.02
    cls_token = jax.random.normal(k_cls, (1, 1, E), dtype=jnp.float32)
    positions = jax.random.normal(k_pos, (N + 1, E), dtype=jnp.float32)

    out = patch_embedding(x, conv_w, conv_b, cls_token, positions, patch_size=P)
    out = jax.block_until_ready(out)

    # Pure-JAX f32 reference (conv as patchify + matmul; same math as the torch module).
    patches_ref = x.reshape(B, C, IMG // P, P, IMG // P, P)
    patches_ref = patches_ref.transpose(0, 2, 4, 1, 3, 5).reshape(B, N, K)
    proj_ref = patches_ref @ conv_w.reshape(E, K).T + conv_b[None, None, :]
    ref = jnp.concatenate(
        [jnp.broadcast_to(cls_token, (B, 1, E)), proj_ref], axis=1) + positions[None]

    assert out.shape == (B, N + 1, E)
    # Tolerance accounts for the bf16 MXU inputs (f32 accumulation); error << 1e-2 here.
    assert jnp.allclose(out, ref, atol=1e-2, rtol=1e-2)

    print("KERNEL_OK")
</pallas_src>

<mosaic_0001>
module attributes {stable_mosaic.version = 11 : i64} {
  func.func @_patch_embed_kernel(%arg0: i32, %arg1: memref<2x17x64xbf16, #tpu.memory_space<vmem>>, %arg2: memref<64x32xbf16, #tpu.memory_space<vmem>>, %arg3: memref<17x32xf32, #tpu.memory_space<vmem>>, %arg4: memref<2x17x32xf32, #tpu.memory_space<vmem>>) attributes {dimension_semantics = [#tpu.dimension_semantics<parallel>], iteration_bounds = array<i64: 1>, scalar_prefetch = 0 : i64, scratch_operands = 0 : i64, tpu.core_type = #tpu.core_type<tc>, window_params = [{transform_indices = @transform_0, window_bounds = array<i64: 2, 17, 64>}, {pipeline_mode = #tpu.pipeline_mode<synchronous>, transform_indices = @transform_1, window_bounds = array<i64: 64, 32>}, {pipeline_mode = #tpu.pipeline_mode<synchronous>, transform_indices = @transform_2, window_bounds = array<i64: 17, 32>}, {transform_indices = @transform_3, window_bounds = array<i64: 2, 17, 32>}]} {
    %c0 = arith.constant 0 : index
    %c0_0 = arith.constant 0 : index
    %0 = vector.load %arg2[%c0, %c0_0] : memref<64x32xbf16, #tpu.memory_space<vmem>>, vector<64x32xbf16>
    %c0_1 = arith.constant 0 : index
    %c0_2 = arith.constant 0 : index
    %1 = vector.load %arg3[%c0_1, %c0_2] : memref<17x32xf32, #tpu.memory_space<vmem>>, vector<17x32xf32>
    %c0_3 = arith.constant 0 : index
    %c0_4 = arith.constant 0 : index
    %c0_5 = arith.constant 0 : index
    %2 = vector.load %arg1[%c0_3, %c0_4, %c0_5] : memref<2x17x64xbf16, #tpu.memory_space<vmem>>, vector<1x17x64xbf16>
    %3 = vector.shape_cast %2 : vector<1x17x64xbf16> to vector<17x64xbf16>
    %cst = arith.constant dense<0.000000e+00> : vector<17x32xf32>
    %4 = tpu.matmul %3, %0, %cst {dimension_numbers = #tpu.dot_dimension_numbers<[1], [0], [0], [1], [0, 0, 1, 1], [], []>} : vector<17x64xbf16>, vector<64x32xbf16>, vector<17x32xf32> -> vector<17x32xf32>
    %5 = arith.addf %4, %1 : vector<17x32xf32>
    %c0_6 = arith.constant 0 : index
    %c0_7 = arith.constant 0 : index
    %c0_8 = arith.constant 0 : index
    %6 = vector.load %arg4[%c0_6, %c0_7, %c0_8] : memref<2x17x32xf32, #tpu.memory_space<vmem>>, vector<1x17x32xf32>
    %7 = vector.shape_cast %6 : vector<1x17x32xf32> to vector<17x32xf32>
    %8 = vector.shape_cast %5 : vector<17x32xf32> to vector<1x17x32xf32>
    tpu.vector_store %arg4[%c0_6, %c0_7, %c0_8], %8 {strides = array<i32>} : memref<2x17x32xf32, #tpu.memory_space<vmem>>, vector<1x17x32xf32>,
    %c1 = arith.constant 1 : index
    %c0_9 = arith.constant 0 : index
    %c0_10 = arith.constant 0 : index
    %9 = vector.load %arg1[%c1, %c0_9, %c0_10] : memref<2x17x64xbf16, #tpu.memory_space<vmem>>, vector<1x17x64xbf16>
    %10 = vector.shape_cast %9 : vector<1x17x64xbf16> to vector<17x64xbf16>
    %cst_11 = arith.constant dense<0.000000e+00> : vector<17x32xf32>
    %11 = tpu.matmul %10, %0, %cst_11 {dimension_numbers = #tpu.dot_dimension_numbers<[1], [0], [0], [1], [0, 0, 1, 1], [], []>} : vector<17x64xbf16>, vector<64x32xbf16>, vector<17x32xf32> -> vector<17x32xf32>
    %12 = arith.addf %11, %1 : vector<17x32xf32>
    %c1_12 = arith.constant 1 : index
    %c0_13 = arith.constant 0 : index
    %c0_14 = arith.constant 0 : index
    %13 = vector.load %arg4[%c1_12, %c0_13, %c0_14] : memref<2x17x32xf32, #tpu.memory_space<vmem>>, vector<1x17x32xf32>
    %14 = vector.shape_cast %13 : vector<1x17x32xf32> to vector<17x32xf32>
    %15 = vector.shape_cast %12 : vector<17x32xf32> to vector<1x17x32xf32>
    tpu.vector_store %arg4[%c1_12, %c0_13, %c0_14], %15 {strides = array<i32>} : memref<2x17x32xf32, #tpu.memory_space<vmem>>, vector<1x17x32xf32>,
    return
  }
  func.func @transform_0(%arg0: i32) -> (i32, i32, i32) {
    %c0_i32 = arith.constant 0 : i32
    %c0_i32_0 = arith.constant 0 : i32
    %c0_i32_1 = arith.constant 0 : i32
    return %arg0, %c0_i32, %c0_i32_0 : i32, i32, i32
  }
  func.func @transform_1(%arg0: i32) -> (i32, i32) {
    %c0_i32 = arith.constant 0 : i32
    %c0_i32_0 = arith.constant 0 : i32
    %c0_i32_1 = arith.constant 0 : i32
    return %c0_i32, %c0_i32_0 : i32, i32
  }
  func.func @transform_2(%arg0: i32) -> (i32, i32) {
    %c0_i32 = arith.constant 0 : i32
    %c0_i32_0 = arith.constant 0 : i32
    %c0_i32_1 = arith.constant 0 : i32
    return %c0_i32, %c0_i32_0 : i32, i32
  }
  func.func @transform_3(%arg0: i32) -> (i32, i32, i32) {
    %c0_i32 = arith.constant 0 : i32
    %c0_i32_0 = arith.constant 0 : i32
    %c0_i32_1 = arith.constant 0 : i32
    return %arg0, %c0_i32, %c0_i32_0 : i32, i32, i32
  }
}

</mosaic_0001>

<bundles_post_ra>
// kernel: patch_embedding.1
= control target key start
LH: loop header
LB: loop body
LE: loop exit
PB: predicated region body
PF: predicated region fallthrough
CT: control target
= control target key end

     0   :  { %vm61_vm0 = vcmask 523264   ;;  %vm119_vm1 = vcmask 253952   ;;  %vm116_vm2 = vcmask 261120   ;;  %s336_s1 = inlined_call_operand.vmem [shape: bf16[64,32], index: 1, kind: input, shape index: {}]   ;;  %s337_s0 = inlined_call_operand.vmem [shape: bf16[2,17,64], index: 0, kind: input, shape index: {}]   ;;  %s338_s2 = inlined_call_operand.vmem [shape: f32[17,32], index: 2, kind: input, shape index: {}]   ;;  %s339_s3 = inlined_call_operand.vmem [shape: f32[2,17,32], index: 3, kind: output, shape index: {}]  }
   0x1   :  { %v249_v0 = vld [vmem:[%s336_s1] sm:$0xff]   ;;  %v250_v1 = vld [vmem:[%s336_s1 + $0x8] sm:$0xff]   ;;  %v251_v2 = vld [vmem:[%s336_s1 + $0x10] sm:$0xff]  }
   0x2   :  { %225 = vmatprep.subr.bf16.mxu0 %v249_v0  ;;  %237 = vmatprep.subr.bf16.mxu1 %v249_v0  ;;  %v253_v3 = vld [vmem:[%s337_s0] sm:$0xff]   ;;  %v254_v4 = vld [vmem:[%s337_s0 + $0xc] sm:$0xff]   ;;  %v252_v5 = vld [vmem:[%s336_s1 + $0x18] sm:$0xff]  }
   0x3   :  { %226 = vmatpush3.bf16.msra.mxu0 %v249_v0  ;;  %238 = vmatpush3.bf16.msra.mxu1 %v249_v0  ;;  %v255_v6 = vld [vmem:[%s337_s0 + $0x8] ss:$0 sps:$4 sm:$0x11]   ;;  %v256_v7 = vld [vmem:[%s337_s0 + $0x14] ss:$0 sps:$4 sm:$0x11]  }
   0x4   :  { %227 = vmatprep.subr.bf16.mxu0 %v250_v1  ;;  %239 = vmatprep.subr.bf16.mxu1 %v250_v1  ;;  %v25_v8 = vld [vmem:[%s338_s2 + $0x10] sm:$0x1]  ;;  %v23_v9 = vld [vmem:[%s338_s2] sm:$0xff]  ;;  %v24_v16 = vld [vmem:[%s338_s2 + $0x8] sm:$0xff] }
   0x5   :  { %233 = vmatprep.mubr.msk.bf16.mxu0 %vm61_vm0, %v253_v3  ;;  %245 = vmatprep.mubr.msk.bf16.mxu1 %vm61_vm0, %v254_v4 }
   0x7   :  { %228 = vmatpush3.bf16.msra.mxu0 %v250_v1  ;;  %240 = vmatpush3.bf16.msra.mxu1 %v250_v1 }
   0x8   :  { %229 = vmatprep.subr.bf16.mxu0 %v251_v2  ;;  %241 = vmatprep.subr.bf16.mxu1 %v251_v2 }
   0xb   :  { %230 = vmatpush3.bf16.msra.mxu0 %v251_v2  ;;  %242 = vmatpush3.bf16.msra.mxu1 %v251_v2 }
   0xc   :  { %231 = vmatprep.subr.bf16.mxu0 %v252_v5  ;;  %243 = vmatprep.subr.bf16.mxu1 %v252_v5 }
   0xf   :  { %232 = vmatpush3.bf16.msra.mxu0 %v252_v5  ;;  %244 = vmatpush3.bf16.msra.mxu1 %v252_v5 }
  0x12   :  { %234 = vmatmul.mubr.msk.bf16.vlgmr.msra.gmra.mrb[0].mxu0 %vm61_vm0, %v255_v6  ;;  %246 = vmatmul.mubr.msk.bf16.vlgmr.msra.gmra.mrb[0].mxu1 %vm61_vm0, %v256_v7 }
  0xe5   :  { %v235_v10 = vpop.f32.mrb[0].mxu0  ;;  %v247_v11 = vpop.f32.mrb[0].mxu1 }
  0xe6   :  { %v111_v12 = vadd.f32 %v235_v10, %v25_v8  ;;  %v182_v13 = vadd.f32 %v247_v11, %v25_v8  ;;  %v102_v14 = vpop.f32.mrb[1].mxu0  ;;  %v173_v15 = vpop.f32.mrb[1].mxu1 }
  0xe7   :  { %v103_v17 = vadd.f32 %v102_v14, %v23_v9  ;;  %v174_v18 = vadd.f32 %v173_v15, %v23_v9  ;;  %v236_v19 = vpop.f32.mrb[2].mxu0  ;;  %v248_v20 = vpop.f32.mrb[2].mxu1 }
  0xe8   :  { %120 = vst.msk [vmem:[%s339_s3 + $0x10] sm:$0x1] %vm119_vm1, %v111_v12  ;;  %212 = vst.msk [vmem:[%s339_s3 + $0x28] sm:$0x1] %vm119_vm1, %v182_v13  ;;  %v105_v21 = vpop.f32.mrb[3].mxu0  ;;  %v176_v22 = vpop.f32.mrb[3].mxu1 }
  0xe9   :  { %117 = vst.msk [vmem:[%s339_s3] sm:$0xff] %vm116_vm2, %v103_v17  ;;  %210 = vst.msk [vmem:[%s339_s3 + $0x18] sm:$0xff] %vm116_vm2, %v174_v18  ;;  %v106_v23 = vadd.f32 %v105_v21, %v24_v16  ;;  %v177_v24 = vadd.f32 %v176_v22, %v24_v16 }
  0xeb   :  { %118 = vst.msk [vmem:[%s339_s3 + $0x8] sm:$0xff] %vm116_vm2, %v106_v23  ;;  %211 = vst.msk [vmem:[%s339_s3 + $0x20] sm:$0xff] %vm116_vm2, %v177_v24 }

</bundles_post_ra>
